<compile_context>
chip_gen: v6e
topology: v6e:2x2x1
jax: 0.10.0
libtpu: 0.0.40
codegen_flags: <defaults>
</compile_context>

<pallas_src>
import jax
import jax.numpy as jnp
from jax.experimental import pallas as pl
from jax.experimental.pallas import tpu as pltpu


def _round_up(x, m):
    return ((x + m - 1) // m) * m


def _first_n_flow_kernel(z_ref, w1_ref, b1_ref, w2_ref, b2_ref, w3_ref, b3_ref,
                         out_ref):
    """One batch tile: full 3-layer MLP + concat, entirely VMEM-resident."""
    z = z_ref[...].astype(jnp.float32)          # (TILE_B, dim_z), loaded once
    # layer 1: Linear + ReLU
    h = jnp.dot(z, w1_ref[...], preferred_element_type=jnp.float32) + b1_ref[...]
    h = jnp.maximum(h, 0.0)
    # layer 2: Linear + ReLU
    h = jnp.dot(h, w2_ref[...], preferred_element_type=jnp.float32) + b2_ref[...]
    h = jnp.maximum(h, 0.0)
    # layer 3: Linear (no activation on the MLP output layer)
    y = jnp.dot(h, w3_ref[...], preferred_element_type=jnp.float32) + b3_ref[...]
    # concat((z, y), dim=-1): build in registers, single lane-dense store.
    out = jnp.concatenate([z, y], axis=-1)
    out_ref[...] = out.astype(out_ref.dtype)


def first_n_flow_layer(z, params, *, tile_b=None):
    """z: (B, dim_z) float32. params: dict of w1,b1,w2,b2,w3,b3 (unpadded)."""
    w1, b1 = params["w1"], params["b1"]
    w2, b2 = params["w2"], params["b2"]
    w3, b3 = params["w3"], params["b3"]
    B, dim_z = z.shape
    gen_nodes = w1.shape[1]
    dim_mlp_out = w3.shape[1]
    dim_x = dim_z + dim_mlp_out

    # Pad the hidden width to a multiple of 128 lanes. Zero-padded columns
    # produce ReLU(0 + 0) = 0 activations, and zero-padded rows of the next
    # weight matrix contribute nothing, so results are bit-identical.
    hp = _round_up(gen_nodes, 128)
    pad = hp - gen_nodes
    if pad:
        w1 = jnp.pad(w1, ((0, 0), (0, pad)))
        b1 = jnp.pad(b1, ((0, 0), (0, pad)))
        w2 = jnp.pad(w2, ((0, pad), (0, pad)))
        b2 = jnp.pad(b2, ((0, 0), (0, pad)))
        w3 = jnp.pad(w3, ((0, pad), (0, 0)))

    # Batch tile: multiple of 8 sublanes, big enough to amortize per-step
    # overhead, small enough to fit every generation's VMEM budget.
    if tile_b is None:
        tile_b = min(_round_up(B, 8), 512)
    grid = (pl.cdiv(B, tile_b),)

    # Rough VMEM bound: weights (single-buffered via constant index_map) +
    # double-buffered z/out tiles + f32 intermediates, with 2x headroom.
    w_bytes = 4 * (dim_z * hp + hp * hp + hp * dim_mlp_out + 2 * hp + dim_mlp_out)
    io_bytes = 4 * 2 * tile_b * (dim_z + dim_x)
    act_bytes = 4 * tile_b * (2 * hp + dim_x)
    vmem_limit = int(min(max(2 * (w_bytes + io_bytes + act_bytes), 4 << 20),
                         32 << 20))

    def pinned(a):
        # full-array block, constant index_map -> fetched once, kept resident.
        return pl.BlockSpec(a.shape, lambda i: (0,) * a.ndim)

    # TODO(synk): for very large dim_x (gen_nodes = dim_x // 4), add a second
    # grid axis tiling w3/b3/out over output features so only a slab of W3 is
    # VMEM-resident (needed for v7x's 64 MiB at dim_x ~ 16k).
    return pl.pallas_call(
        _first_n_flow_kernel,
        out_shape=jax.ShapeDtypeStruct((B, dim_x), z.dtype),
        grid=grid,
        in_specs=[
            pl.BlockSpec((tile_b, dim_z), lambda i: (i, 0)),
            pinned(w1), pinned(b1),
            pinned(w2), pinned(b2),
            pinned(w3), pinned(b3),
        ],
        out_specs=pl.BlockSpec((tile_b, dim_x), lambda i: (i, 0)),
        compiler_params=pltpu.CompilerParams(
            dimension_semantics=("parallel",),   # megacore sharding on v7x
            vmem_limit_bytes=vmem_limit,
        ),
    )(z, w1, b1, w2, b2, w3, b3)


def init_params(key, dim_x, dim_z, min_gen_nodes=30):
    gen_nodes = max(min_gen_nodes, dim_x // 4)
    dim_out = dim_x - dim_z
    k1, k2, k3 = jax.random.split(key, 3)
    scale = 0.1
    return {
        "w1": scale * jax.random.normal(k1, (dim_z, gen_nodes), jnp.float32),
        "b1": jnp.zeros((1, gen_nodes), jnp.float32),
        "w2": scale * jax.random.normal(k2, (gen_nodes, gen_nodes), jnp.float32),
        "b2": jnp.zeros((1, gen_nodes), jnp.float32),
        "w3": scale * jax.random.normal(k3, (gen_nodes, dim_out), jnp.float32),
        "b3": jnp.zeros((1, dim_out), jnp.float32),
    }


def reference_forward(z, params):
    """Pure-JAX reference matching the PyTorch module semantics."""
    h = jnp.maximum(z @ params["w1"] + params["b1"], 0.0)
    h = jnp.maximum(h @ params["w2"] + params["b2"], 0.0)
    y = h @ params["w3"] + params["b3"]
    return jnp.concatenate([z, y], axis=-1)


if __name__ == "__main__":
    # Shapes consistent with the module: dim_x=16, dim_z=4 ->
    # gen_nodes = max(30, 16 // 4) = 30, MLP output dim = 12, final dim = 16.
    dim_x, dim_z = 16, 4
    key = jax.random.PRNGKey(0)
    k_param, k_z1, k_z2 = jax.random.split(key, 3)
    params = init_params(k_param, dim_x, dim_z)

    # 1) single-tile case (B = 8, grid = 1)
    B = 8
    z = jax.random.normal(k_z1, (B, dim_z), jnp.float32)
    out = jax.block_until_ready(first_n_flow_layer(z, params))
    ref = reference_forward(z, params)
    assert out.shape == (B, dim_x), out.shape
    assert jnp.allclose(out, ref, atol=1e-5, rtol=1e-5), "mismatch vs reference"

    # 2) multi-tile batch grid (B = 64, tile_b = 16 -> 4 grid steps)
    B2 = 64
    z2 = jax.random.normal(k_z2, (B2, dim_z), jnp.float32)
    out2 = jax.block_until_ready(first_n_flow_layer(z2, params, tile_b=16))
    ref2 = reference_forward(z2, params)
    assert out2.shape == (B2, dim_x), out2.shape
    assert jnp.allclose(out2, ref2, atol=1e-5, rtol=1e-5), "mismatch (tiled)"

    print("KERNEL_OK")
</pallas_src>

<mosaic_0001>
module attributes {stable_mosaic.version = 11 : i64} {
  func.func @_first_n_flow_kernel(%arg0: i32, %arg1: memref<8x4xf32, #tpu.memory_space<vmem>>, %arg2: memref<4x128xf32, #tpu.memory_space<vmem>>, %arg3: memref<1x128xf32, #tpu.memory_space<vmem>>, %arg4: memref<128x128xf32, #tpu.memory_space<vmem>>, %arg5: memref<1x128xf32, #tpu.memory_space<vmem>>, %arg6: memref<128x12xf32, #tpu.memory_space<vmem>>, %arg7: memref<1x12xf32, #tpu.memory_space<vmem>>, %arg8: memref<8x16xf32, #tpu.memory_space<vmem>>) attributes {dimension_semantics = [#tpu.dimension_semantics<parallel>], iteration_bounds = array<i64: 1>, scalar_prefetch = 0 : i64, scratch_operands = 0 : i64, tpu.core_type = #tpu.core_type<tc>, window_params = [{transform_indices = @transform_0, window_bounds = array<i64: 8, 4>}, {pipeline_mode = #tpu.pipeline_mode<synchronous>, transform_indices = @transform_1, window_bounds = array<i64: 4, 128>}, {pipeline_mode = #tpu.pipeline_mode<synchronous>, transform_indices = @transform_2, window_bounds = array<i64: 1, 128>}, {pipeline_mode = #tpu.pipeline_mode<synchronous>, transform_indices = @transform_3, window_bounds = array<i64: 128, 128>}, {pipeline_mode = #tpu.pipeline_mode<synchronous>, transform_indices = @transform_4, window_bounds = array<i64: 1, 128>}, {pipeline_mode = #tpu.pipeline_mode<synchronous>, transform_indices = @transform_5, window_bounds = array<i64: 128, 12>}, {pipeline_mode = #tpu.pipeline_mode<synchronous>, transform_indices = @transform_6, window_bounds = array<i64: 1, 12>}, {transform_indices = @transform_7, window_bounds = array<i64: 8, 16>}]} {
    %c0 = arith.constant 0 : index
    %c0_0 = arith.constant 0 : index
    %0 = vector.load %arg1[%c0, %c0_0] : memref<8x4xf32, #tpu.memory_space<vmem>>, vector<8x4xf32>
    %c0_1 = arith.constant 0 : index
    %c0_2 = arith.constant 0 : index
    %1 = vector.load %arg2[%c0_1, %c0_2] : memref<4x128xf32, #tpu.memory_space<vmem>>, vector<4x128xf32>
    %cst = arith.constant dense<0.000000e+00> : vector<8x128xf32>
    %2 = tpu.matmul %0, %1, %cst {dimension_numbers = #tpu.dot_dimension_numbers<[1], [0], [0], [1], [0, 0, 1, 1], [], []>} : vector<8x4xf32>, vector<4x128xf32>, vector<8x128xf32> -> vector<8x128xf32>
    %c0_3 = arith.constant 0 : index
    %c0_4 = arith.constant 0 : index
    %3 = vector.load %arg3[%c0_3, %c0_4] : memref<1x128xf32, #tpu.memory_space<vmem>>, vector<1x128xf32>
    %4 = vector.broadcast %3 : vector<1x128xf32> to vector<8x128xf32>
    %5 = arith.addf %2, %4 : vector<8x128xf32>
    %cst_5 = arith.constant 0.000000e+00 : f32
    %6 = vector.broadcast %cst_5 : f32 to vector<8x128xf32>
    %7 = arith.maximumf %5, %6 : vector<8x128xf32>
    %c0_6 = arith.constant 0 : index
    %c0_7 = arith.constant 0 : index
    %8 = vector.load %arg4[%c0_6, %c0_7] : memref<128x128xf32, #tpu.memory_space<vmem>>, vector<128x128xf32>
    %cst_8 = arith.constant dense<0.000000e+00> : vector<8x128xf32>
    %9 = tpu.matmul %7, %8, %cst_8 {dimension_numbers = #tpu.dot_dimension_numbers<[1], [0], [0], [1], [0, 0, 1, 1], [], []>} : vector<8x128xf32>, vector<128x128xf32>, vector<8x128xf32> -> vector<8x128xf32>
    %c0_9 = arith.constant 0 : index
    %c0_10 = arith.constant 0 : index
    %10 = vector.load %arg5[%c0_9, %c0_10] : memref<1x128xf32, #tpu.memory_space<vmem>>, vector<1x128xf32>
    %11 = vector.broadcast %10 : vector<1x128xf32> to vector<8x128xf32>
    %12 = arith.addf %9, %11 : vector<8x128xf32>
    %cst_11 = arith.constant 0.000000e+00 : f32
    %13 = vector.broadcast %cst_11 : f32 to vector<8x128xf32>
    %14 = arith.maximumf %12, %13 : vector<8x128xf32>
    %c0_12 = arith.constant 0 : index
    %c0_13 = arith.constant 0 : index
    %15 = vector.load %arg6[%c0_12, %c0_13] : memref<128x12xf32, #tpu.memory_space<vmem>>, vector<128x12xf32>
    %cst_14 = arith.constant dense<0.000000e+00> : vector<8x12xf32>
    %16 = tpu.matmul %14, %15, %cst_14 {dimension_numbers = #tpu.dot_dimension_numbers<[1], [0], [0], [1], [0, 0, 1, 1], [], []>} : vector<8x128xf32>, vector<128x12xf32>, vector<8x12xf32> -> vector<8x12xf32>
    %c0_15 = arith.constant 0 : index
    %c0_16 = arith.constant 0 : index
    %17 = vector.load %arg7[%c0_15, %c0_16] : memref<1x12xf32, #tpu.memory_space<vmem>>, vector<1x12xf32>
    %18 = vector.broadcast %17 : vector<1x12xf32> to vector<8x12xf32>
    %19 = arith.addf %16, %18 : vector<8x12xf32>
    %20 = tpu.concatenate %0, %19 in 1 : vector<8x4xf32>, vector<8x12xf32> -> vector<8x16xf32>
    %c0_17 = arith.constant 0 : index
    %c0_18 = arith.constant 0 : index
    %21 = vector.load %arg8[%c0_17, %c0_18] : memref<8x16xf32, #tpu.memory_space<vmem>>, vector<8x16xf32>
    tpu.vector_store %arg8[%c0_17, %c0_18], %20 {strides = array<i32>} : memref<8x16xf32, #tpu.memory_space<vmem>>, vector<8x16xf32>,
    return
  }
  func.func @transform_0(%arg0: i32) -> (i32, i32) {
    %c0_i32 = arith.constant 0 : i32
    %c0_i32_0 = arith.constant 0 : i32
    return %arg0, %c0_i32 : i32, i32
  }
  func.func @transform_1(%arg0: i32) -> (i32, i32) {
    %c0_i32 = arith.constant 0 : i32
    %c0_i32_0 = arith.constant 0 : i32
    %c0_i32_1 = arith.constant 0 : i32
    return %c0_i32, %c0_i32_0 : i32, i32
  }
  func.func @transform_2(%arg0: i32) -> (i32, i32) {
    %c0_i32 = arith.constant 0 : i32
    %c0_i32_0 = arith.constant 0 : i32
    %c0_i32_1 = arith.constant 0 : i32
    return %c0_i32, %c0_i32_0 : i32, i32
  }
  func.func @transform_3(%arg0: i32) -> (i32, i32) {
    %c0_i32 = arith.constant 0 : i32
    %c0_i32_0 = arith.constant 0 : i32
    %c0_i32_1 = arith.constant 0 : i32
    return %c0_i32, %c0_i32_0 : i32, i32
  }
  func.func @transform_4(%arg0: i32) -> (i32, i32) {
    %c0_i32 = arith.constant 0 : i32
    %c0_i32_0 = arith.constant 0 : i32
    %c0_i32_1 = arith.constant 0 : i32
    return %c0_i32, %c0_i32_0 : i32, i32
  }
  func.func @transform_5(%arg0: i32) -> (i32, i32) {
    %c0_i32 = arith.constant 0 : i32
    %c0_i32_0 = arith.constant 0 : i32
    %c0_i32_1 = arith.constant 0 : i32
    return %c0_i32, %c0_i32_0 : i32, i32
  }
  func.func @transform_6(%arg0: i32) -> (i32, i32) {
    %c0_i32 = arith.constant 0 : i32
    %c0_i32_0 = arith.constant 0 : i32
    %c0_i32_1 = arith.constant 0 : i32
    return %c0_i32, %c0_i32_0 : i32, i32
  }
  func.func @transform_7(%arg0: i32) -> (i32, i32) {
    %c0_i32 = arith.constant 0 : i32
    %c0_i32_0 = arith.constant 0 : i32
    return %arg0, %c0_i32 : i32, i32
  }
}

</mosaic_0001>

<bundles_post_ra>
// kernel: tpu_custom_call.1
= control target key start
LH: loop header
LB: loop body
LE: loop exit
PB: predicated region body
PF: predicated region fallthrough
CT: control target
= control target key end

     0   :  { %vm40_vm0 = vcmask 1043456   ;;  %v465_v2 = vmov 0.0   ;;  %vm466_vm1 = vmmov 0   ;;  %vm36_vm2 = vcmask 31744   ;;  %s668_s0 = inlined_call_operand.vmem [shape: f32[8,4], index: 0, kind: input, shape index: {}]   ;;  %s669_s1 = inlined_call_operand.vmem [shape: f32[4,128], index: 1, kind: input, shape index: {}]   ;;  %s670_s2 = inlined_call_operand.vmem [shape: f32[1,128], index: 2, kind: input, shape index: {}]   ;;  %s671_s3 = inlined_call_operand.vmem [shape: f32[128,128], index: 3, kind: input, shape index: {}]   ;;  %s672_s4 = inlined_call_operand.vmem [shape: f32[1,128], index: 4, kind: input, shape index: {}]   ;;  %s673_s5 = inlined_call_operand.vmem [shape: f32[128,12], index: 5, kind: input, shape index: {}]   ;;  %s674_s6 = inlined_call_operand.vmem [shape: f32[1,12], index: 6, kind: input, shape index: {}]   ;;  %s675_s7 = inlined_call_operand.hbm [shape: f32[8,16], index: 7, kind: output, shape index: {}]  }
   0x1   :  { %v28_v0 = vld [vmem:[%s669_s1] sm:$0xf]  ;;  %364 = vmatprep.subr.mxu0 %v465_v2  ;;  %366 = vmatprep.mubr.msk.f32.mxu0 %vm466_vm1, %v465_v2  ;;  %v130_v3 = vld [vmem:[%s671_s3 + $0x78] sm:$0xff]  ;;  %v129_v4 = vld [vmem:[%s671_s3 + $0x70] sm:$0xff] }
   0x2   :  { %v515_v1 = vld [vmem:[%s668_s0] sm:$0xff]  ;;  %365 = vmatpush3.msk.msra.mxu0 %vm40_vm0, %v28_v0  ;;  %369 = vmatprep.subr.mxu1 %v465_v2  ;;  %v128_v5 = vld [vmem:[%s671_s3 + $0x68] sm:$0xff] }
   0x3   :  { %367 = vmatmul.mubr.msk.f32.vlgmr.msra.gmra.mxu0 %vm36_vm2, %v515_v1  ;;  %370 = vmatpush3.msra.mxu1 %v130_v3 }
   0x4   :  { %371 = vmatprep.subr.mxu1 %v465_v2  ;;  %401 = vmatprep.mubr.msk.f32.mxu1 %vm466_vm1, %v465_v2 }
   0x5   :  { %372 = vmatpush3.msra.mxu1 %v129_v4  ;;  %404 = vmatprep.subr.mxu0 %v465_v2 }
   0x6   :  { %12 = vsyncpa [#allocation3], 0  ;;  %373 = vmatprep.subr.mxu1 %v465_v2  ;;  %v127_v6 = vld [vmem:[%s671_s3 + $0x60] sm:$0xff]  ;;  %436 = vmatprep.mubr.msk.f32.mxu0 %vm466_vm1, %v465_v2  ;;  %v126_v7 = vld [vmem:[%s671_s3 + $0x58] sm:$0xff]  ;;  %s467_s20 = smov 4   ;;  %vm307_vm3 = vcmask 130048  }
   0x7   :  { %374 = vmatpush3.msra.mxu1 %v128_v5  ;;  %v125_v8 = vld [vmem:[%s671_s3 + $0x50] sm:$0xff]  ;;  %v124_v9 = vld [vmem:[%s671_s3 + $0x48] sm:$0xff]  ;;  %v123_v10 = vld [vmem:[%s671_s3 + $0x40] sm:$0xff] }
   0x8   :  { %375 = vmatprep.subr.mxu1 %v465_v2  ;;  %v122_v11 = vld [vmem:[%s671_s3 + $0x38] sm:$0xff]  ;;  %v121_v12 = vld [vmem:[%s671_s3 + $0x30] sm:$0xff]  ;;  %v120_v13 = vld [vmem:[%s671_s3 + $0x28] sm:$0xff] }
   0x9   :  { %376 = vmatpush3.msra.mxu1 %v127_v6  ;;  %v119_v14 = vld [vmem:[%s671_s3 + $0x20] sm:$0xff]  ;;  %v118_v15 = vld [vmem:[%s671_s3 + $0x18] sm:$0xff]  ;;  %v117_v16 = vld [vmem:[%s671_s3 + $0x10] sm:$0xff] }
   0xa   :  { %377 = vmatprep.subr.mxu1 %v465_v2  ;;  %v116_v17 = vld [vmem:[%s671_s3 + $0x8] sm:$0xff]  ;;  %v115_v18 = vld [vmem:[%s671_s3] sm:$0xff]  ;;  %v224_v19 = vld [vmem:[%s673_s5 + $0x78] sm:$0xff] }
   0xb   :  { %378 = vmatpush3.msra.mxu1 %v126_v7  ;;  %v223_v20 = vld [vmem:[%s673_s5 + $0x70] sm:$0xff]  ;;  %405 = vmatpush3.msra.mxu0 %v224_v19  ;;  %v222_v21 = vld [vmem:[%s673_s5 + $0x68] sm:$0xff]  ;;  %v221_v22 = vld [vmem:[%s673_s5 + $0x60] sm:$0xff] }
   0xc   :  { %379 = vmatprep.subr.mxu1 %v465_v2  ;;  %406 = vmatprep.subr.mxu0 %v465_v2  ;;  %v220_v23 = vld [vmem:[%s673_s5 + $0x58] sm:$0xff]  ;;  %v219_v24 = vld [vmem:[%s673_s5 + $0x50] sm:$0xff]  ;;  %v218_v25 = vld [vmem:[%s673_s5 + $0x48] sm:$0xff] }
   0xd   :  { %380 = vmatpush3.msra.mxu1 %v125_v8  ;;  %407 = vmatpush3.msra.mxu0 %v223_v20  ;;  %v217_v26 = vld [vmem:[%s673_s5 + $0x40] sm:$0xff]  ;;  %v216_v27 = vld [vmem:[%s673_s5 + $0x38] sm:$0xff]  ;;  %v215_v28 = vld [vmem:[%s673_s5 + $0x30] sm:$0xff] }
   0xe   :  { %381 = vmatprep.subr.mxu1 %v465_v2  ;;  %408 = vmatprep.subr.mxu0 %v465_v2  ;;  %v214_v29 = vld [vmem:[%s673_s5 + $0x28] sm:$0xff]  ;;  %v213_v30 = vld [vmem:[%s673_s5 + $0x20] sm:$0xff]  ;;  %v212_v31 = vld [vmem:[%s673_s5 + $0x18] sm:$0xff] }
   0xf   :  { %382 = vmatpush3.msra.mxu1 %v124_v9  ;;  %409 = vmatpush3.msra.mxu0 %v222_v21  ;;  %v323_v32 = vld [vmem:[%s670_s2] ss:$0 sm:$0xff]  ;;  %v211_v37 = vld [vmem:[%s673_s5 + $0x10] sm:$0xff]  ;;  %v210_v38 = vld [vmem:[%s673_s5 + $0x8] sm:$0xff] }
  0x10   :  { %383 = vmatprep.subr.mxu1 %v465_v2  ;;  %410 = vmatprep.subr.mxu0 %v465_v2  ;;  %v209_v39 = vld [vmem:[%s673_s5] sm:$0xff]  ;;  %s468_s5 = smov [#allocation2]  }
  0x11   :  { %384 = vmatpush3.msra.mxu1 %v123_v10  ;;  %411 = vmatpush3.msra.mxu0 %v221_v22  ;;  %v326_v40 = vld [vmem:[%s672_s4] ss:$0 sm:$0xff]  ;;  %s315_s21 = sshll.u32 %s468_s5, 4  ;;  %s316_s21 = int_to_ptr.vmem [resolvable:$true] %s315_s21 }
  0x12   :  { %385 = vmatprep.subr.mxu1 %v465_v2  ;;  %412 = vmatprep.subr.mxu0 %v465_v2  ;;  %v327_v45 = vld [vmem:[%s674_s6] ss:$0 sm:$0xff]  ;;  %s443_s4 = scalar_lea.vmem %s316_s21, 128  ;;  %p448_p1 = scmp.lt.s32.totalorder %s316_s21, %s316_s21 }
  0x13   :  { %386 = vmatpush3.msra.mxu1 %v122_v11  ;;  %413 = vmatpush3.msra.mxu0 %v220_v23  ;;  %p444_p0 = scmp.ne.s32.totalorder %s316_s21, %s443_s4  ;;  %p449_p2 = scmp.lt.s32.totalorder %s443_s4, %s443_s4 }
  0x14   :  { %387 = vmatprep.subr.mxu1 %v465_v2  ;;  %414 = vmatprep.subr.mxu0 %v465_v2 }
  0x15   :  { %388 = vmatpush3.msra.mxu1 %v121_v12  ;;  %415 = vmatpush3.msra.mxu0 %v219_v24  ;;  %p450_p3 = por %p449_p2, %p448_p1 }
  0x16   :  { %389 = vmatprep.subr.mxu1 %v465_v2  ;;  %416 = vmatprep.subr.mxu0 %v465_v2 }
  0x17   :  { %390 = vmatpush3.msra.mxu1 %v120_v13  ;;  %417 = vmatpush3.msra.mxu0 %v218_v25  ;;  %p451_p4 = pnand %p450_p3, %p444_p0 }
  0x18   :  { %391 = vmatprep.subr.mxu1 %v465_v2  ;;  %418 = vmatprep.subr.mxu0 %v465_v2 }
  0x19   :  { %392 = vmatpush3.msra.mxu1 %v119_v14  ;;  %419 = vmatpush3.msra.mxu0 %v217_v26 }
  0x1a   :  { %393 = vmatprep.subr.mxu1 %v465_v2  ;;  %420 = vmatprep.subr.mxu0 %v465_v2 }
  0x1b   :  { %394 = vmatpush3.msra.mxu1 %v118_v15  ;;  %421 = vmatpush3.msra.mxu0 %v216_v27 }
  0x1c   :  { %395 = vmatprep.subr.mxu1 %v465_v2  ;;  %422 = vmatprep.subr.mxu0 %v465_v2 }
  0x1d   :  { %396 = vmatpush3.msra.mxu1 %v117_v16  ;;  %423 = vmatpush3.msra.mxu0 %v215_v28 }
  0x1e   :  { %397 = vmatprep.subr.mxu1 %v465_v2  ;;  %424 = vmatprep.subr.mxu0 %v465_v2 }
  0x1f   :  { %398 = vmatpush3.msra.mxu1 %v116_v17  ;;  %425 = vmatpush3.msra.mxu0 %v214_v29 }
  0x20   :  { %399 = vmatprep.subr.mxu1 %v465_v2  ;;  %426 = vmatprep.subr.mxu0 %v465_v2 }
  0x21   :  { %400 = vmatpush3.msra.mxu1 %v115_v18  ;;  %427 = vmatpush3.msra.mxu0 %v213_v30 }
  0x22   :  { %428 = vmatprep.subr.mxu0 %v465_v2 }
  0x23   :  { %429 = vmatpush3.msra.mxu0 %v212_v31 }
  0x24   :  { %430 = vmatprep.subr.mxu0 %v465_v2 }
  0x25   :  { %431 = vmatpush3.msra.mxu0 %v211_v37 }
  0x26   :  { %432 = vmatprep.subr.mxu0 %v465_v2 }
  0x27   :  { %433 = vmatpush3.msra.mxu0 %v210_v38 }
  0x28   :  { %434 = vmatprep.subr.mxu0 %v465_v2 }
  0x29   :  { %435 = vmatpush3.msra.mxu0 %v209_v39 }
  0xc3   :  { %v110_v33 = vpop.f32.mrf.mxu0 }
  0xc4   :  { %v111_v34 = vadd.f32 %v323_v32, %v110_v33 }
  0xc5   :  { %v368_v35 = vpop.f32.mrf.mxu0 }
  0xc6   :  { %v114_v36 = vmax.f32 %v111_v34, 0.0 }
  0xc8   :  { %402 = vmatmul.mubr.f32.vlgmr.msra.gmra.mxu1 %v114_v36 }
 0x188   :  { %v204_v41 = vpop.f32.mrf.mxu1 }
 0x189   :  { %v205_v42 = vadd.f32 %v326_v40, %v204_v41 }
 0x18a   :  { %v403_v43 = vpop.f32.mrf.mxu1 }
 0x18b   :  { %v208_v44 = vmax.f32 %v205_v42, 0.0 }
 0x18d   :  { %437 = vmatmul.mubr.f32.vlgmr.msra.gmra.mxu0 %v208_v44 }
 0x24d   :  { %v298_v46 = vpop.f32.mrf.mxu0 }
 0x24e   :  { %v299_v47 = vadd.f32 %v327_v45, %v298_v46 }
 0x24f   :  { %v438_v48 = vpop.f32.mrf.mxu0 }
 0x250   :  { %303 = vrot.lane.b32.xlu0 %v299_v47, %s467_s20 }
 0x2c2   :  { %v304_v49 = vpop.permute.xlu0 %303 }
 0x2c3   :  { %v306_v50 = vsel %vm36_vm2, %v515_v1, %v304_v49 }
 0x2c4   :  { %308 = vst.msk [vmem:[#allocation2] sm:$0xff] %vm307_vm3, %v306_v50 }
 0x2c5   :  { %454 = shalt.err (!%p451_p4)
}
 0x2c6   :  { %318 = dma.vmem_to_hbm [thread:$0]  %s316_s21, 128, %s675_s7, [#allocation3]  }
 0x2c7   :  { %463 = dma.done.wait [#allocation3], 128  }
 0x2c8   :  { %464 = vsyncadd [#allocation3], 4294967168 }
 0x2c9   :  { %322 = vsyncpa [#allocation3], 1 }

</bundles_post_ra>
